<compile_context>
chip_gen: v5e
topology: v5e:2x2
jax: 0.10.0
libtpu: 0.0.40
codegen_flags: <defaults>
</compile_context>

<pallas_src>
import jax
import jax.numpy as jnp
from jax.experimental import pallas as pl
from jax.experimental.pallas import tpu as pltpu


def _relu_kernel(x_ref, o_ref):
    # Pure VPU elementwise max(x, 0) on the whole VMEM tile.
    o_ref[...] = jnp.maximum(x_ref[...], 0)


def _max_tile_bytes_for_device() -> int:
    """Per-generation streaming tile size (bytes)."""
    kind = ""
    try:
        kind = jax.devices()[0].device_kind.lower()
    except Exception:
        pass
    if "v5" in kind:
        # v5e: default scoped VMEM is 16 MiB; 4 x 2 MiB stays comfortably inside.
        return 2 * 1024 * 1024
    if "7" in kind:
        # v7x: 3.2 TB/s HBM -> large tiles amortize ~0.35 us/step overhead.
        return 8 * 1024 * 1024
    # v6e / unknown.
    return 4 * 1024 * 1024


def _relu_2d(x2d: jax.Array, rows: int, lanes: int, dtype, itemsize: int,
             sublane_mult: int) -> jax.Array:
    tile_target = _max_tile_bytes_for_device()
    tile_rows = max(1, tile_target // (lanes * itemsize))
    tile_rows = max(sublane_mult, (tile_rows // sublane_mult) * sublane_mult)

    if rows > tile_rows:
        block_rows = tile_rows
    elif rows >= 2 * sublane_mult:
        # Split mid-size inputs into at least 2 sublane-aligned blocks so the
        # grid can pipeline DMA/compute and v7x can use both TensorCores.
        half = (rows + 1) // 2
        block_rows = ((half + sublane_mult - 1) // sublane_mult) * sublane_mult
    else:
        # Tiny input: a single block equal to the full dims is always legal.
        block_rows = rows

    grid = (pl.cdiv(rows, block_rows),)

    # Double-buffered input + output = 4 tiles; add margin, cap below physical
    # VMEM on every generation (v7x has only 64 MiB total per TensorCore).
    tile_bytes = block_rows * lanes * itemsize
    vmem_limit = int(min(4 * tile_bytes + (4 << 20), 48 << 20))

    return pl.pallas_call(
        _relu_kernel,
        out_shape=jax.ShapeDtypeStruct((rows, lanes), dtype),
        grid_spec=pltpu.PrefetchScalarGridSpec(
            num_scalar_prefetch=0,
            grid=grid,
            in_specs=[pl.BlockSpec((block_rows, lanes), lambda i: (i, 0))],
            out_specs=pl.BlockSpec((block_rows, lanes), lambda i: (i, 0)),
        ),
        compiler_params=pltpu.CompilerParams(
            dimension_semantics=("parallel",),
            vmem_limit_bytes=vmem_limit,
        ),
        cost_estimate=pl.CostEstimate(
            flops=rows * lanes,
            transcendentals=0,
            bytes_accessed=2 * rows * lanes * itemsize,
        ),
    )(x2d)


def relu_pallas(x: jax.Array) -> jax.Array:
    """ReLU over an arbitrary-shaped array via a lane-dense Pallas TPU kernel."""
    orig_shape = x.shape
    dtype = x.dtype
    total = x.size
    if total == 0:
        return x

    itemsize = jnp.dtype(dtype).itemsize
    # Native sublane packing: f32 -> 8 rows/vreg, bf16 -> 16, int8/fp8 -> 32.
    sublane_mult = {4: 8, 2: 16, 1: 32}.get(itemsize, 8)

    # Widest lane count (multiple of 128) that divides the flat size -> no
    # pad/slice round-trip through HBM.
    lanes = None
    for cand in (1024, 512, 256, 128):
        if total % cand == 0:
            lanes = cand
            break

    x_flat = jnp.ravel(x)

    if lanes is not None:
        rows = total // lanes
        out2d = _relu_2d(x_flat.reshape(rows, lanes), rows, lanes, dtype,
                         itemsize, sublane_mult)
        return out2d.reshape(orig_shape)

    # Flat size not a multiple of 128: run the kernel on the lane-aligned
    # prefix and handle the < 128-element tail with plain jnp.maximum.
    lanes = 128
    main = (total // lanes) * lanes
    if main == 0:
        return jnp.maximum(x, 0)
    rows = main // lanes
    head2d = _relu_2d(x_flat[:main].reshape(rows, lanes), rows, lanes, dtype,
                      itemsize, sublane_mult)
    tail = jnp.maximum(x_flat[main:], 0)
    return jnp.concatenate([head2d.reshape(-1), tail]).reshape(orig_shape)


if __name__ == "__main__":
    key = jax.random.PRNGKey(0)
    # Small NCHW-shaped input consistent with the module's conv-style usage.
    x = jax.random.normal(key, (2, 4, 16, 16), dtype=jnp.float32)

    y = relu_pallas(x)
    jax.block_until_ready(y)

    # Sanity check against the reference semantics of nn.ReLU.
    ref = jnp.maximum(x, 0.0)
    assert y.shape == x.shape and y.dtype == x.dtype
    assert bool(jnp.allclose(y, ref)), "mismatch vs reference ReLU"

    # Also exercise a non-multiple-of-128 flat size (ragged-tail path).
    x2 = jax.random.normal(key, (3, 5, 7), dtype=jnp.float32)
    y2 = relu_pallas(x2)
    jax.block_until_ready(y2)
    assert bool(jnp.allclose(y2, jnp.maximum(x2, 0.0))), "mismatch on ragged path"

    print("KERNEL_OK")
</pallas_src>

<mosaic_0001>
module attributes {stable_mosaic.version = 11 : i64} {
  func.func @_relu_kernel(%arg0: i32, %arg1: memref<2x1024xf32, #tpu.memory_space<vmem>>, %arg2: memref<2x1024xf32, #tpu.memory_space<vmem>>) attributes {dimension_semantics = [#tpu.dimension_semantics<parallel>], iteration_bounds = array<i64: 1>, scalar_prefetch = 0 : i64, scratch_operands = 0 : i64, tpu.core_type = #tpu.core_type<tc>, window_params = [{transform_indices = @transform_0, window_bounds = array<i64: 2, 1024>}, {transform_indices = @transform_1, window_bounds = array<i64: 2, 1024>}]} {
    %c0 = arith.constant 0 : index
    %c0_0 = arith.constant 0 : index
    %0 = vector.load %arg1[%c0, %c0_0] : memref<2x1024xf32, #tpu.memory_space<vmem>>, vector<2x1024xf32>
    %cst = arith.constant 0.000000e+00 : f32
    %1 = vector.broadcast %cst : f32 to vector<2x1024xf32>
    %2 = arith.maximumf %0, %1 : vector<2x1024xf32>
    %c0_1 = arith.constant 0 : index
    %c0_2 = arith.constant 0 : index
    %3 = vector.load %arg2[%c0_1, %c0_2] : memref<2x1024xf32, #tpu.memory_space<vmem>>, vector<2x1024xf32>
    tpu.vector_store %arg2[%c0_1, %c0_2], %2 {strides = array<i32>} : memref<2x1024xf32, #tpu.memory_space<vmem>>, vector<2x1024xf32>,
    return
  }
  func.func @transform_0(%arg0: i32) -> (i32, i32) {
    %c0_i32 = arith.constant 0 : i32
    %c0_i32_0 = arith.constant 0 : i32
    return %arg0, %c0_i32 : i32, i32
  }
  func.func @transform_1(%arg0: i32) -> (i32, i32) {
    %c0_i32 = arith.constant 0 : i32
    %c0_i32_0 = arith.constant 0 : i32
    return %arg0, %c0_i32 : i32, i32
  }
}

</mosaic_0001>

<bundles_post_ra>
// kernel: tpu_custom_call.1
= control target key start
LH: loop header
LB: loop body
LE: loop exit
PB: predicated region body
PF: predicated region fallthrough
CT: control target
= control target key end

     0   :  { %6 = vsyncpa [#allocation3], 0  ;;  %s118_s0 = inlined_call_operand.hbm [shape: f32[2,1024], index: 0, kind: input, shape index: {}]   ;;  %s119_s1 = inlined_call_operand.hbm [shape: f32[2,1024], index: 1, kind: output, shape index: {}]  }
   0x1   :  { %7 = vsyncpa [#allocation4], 0  ;;  %s13_s8 = sshll.u32 %s118_s0, 4  ;;  %s100_s9 = smov [#allocation2]   ;;  %s14_s8 = int_to_ptr.hbm [resolvable:$true] %s13_s8 }
   0x2   :  { %s15_s10 = sshll.u32 %s100_s9, 4  ;;  %s16_s10 = int_to_ptr.vmem [resolvable:$true] %s15_s10 }
   0x3   :  { %18 = dma.hbm_to_vmem [thread:$0]  %s14_s8, 256, %s16_s10, [#allocation3]  }
   0x4   :  { %96 = dma.done.wait [#allocation3], 256  }
   0x5   :  { %97 = vsyncadd [#allocation3], 4294967040  ;;  %s101_s11 = smov [#allocation5]   ;;  %s36_s15 = sshll.u32 %s119_s1, 4  ;;  %v23_v0 = vld [vmem:[#allocation2] sm:$0xff]  ;;  %v24_v1 = vld [vmem:[#allocation2 + $0x8] sm:$0xff]  ;;  %s37_s15 = int_to_ptr.hbm [resolvable:$true] %s36_s15 }
   0x6   :  { %s34_s12 = sshll.u32 %s101_s11, 4  ;;  %v25_v2 = vmax.f32 %v23_v0, 0.0  ;;  %v26_v3 = vmax.f32 %v24_v1, 0.0  ;;  %s35_s12 = int_to_ptr.vmem [resolvable:$true] %s34_s12 }
   0x8   :  { %27 = vst [vmem:[#allocation5] sm:$0xff] %v25_v2 }
   0x9   :  { %28 = vst [vmem:[#allocation5 + $0x8] sm:$0xff] %v26_v3 }
   0xa   :  { %39 = dma.vmem_to_hbm [thread:$0]  %s35_s12, 256, %s37_s15, [#allocation4]  }
   0xb   :  { %98 = dma.done.wait [#allocation4], 256  }
   0xc   :  { %99 = vsyncadd [#allocation4], 4294967040 }
   0xd   :  { %44 = vsyncpa [#allocation3], 1 }
   0xe   :  { %45 = vsyncpa [#allocation4], 1 }

</bundles_post_ra>
